<compile_context>
chip_gen: v5e
topology: v5e:2x2
jax: 0.10.0
libtpu: 0.0.40
codegen_flags: <defaults>
</compile_context>

<pallas_src>
import functools

import jax
import jax.numpy as jnp
from jax.experimental import pallas as pl
from jax.experimental.pallas import tpu as pltpu


def _round_up(x: int, m: int) -> int:
    return ((x + m - 1) // m) * m


def linear_kernel(x_ref, w_ref, b_ref, o_ref):
    # x_ref: (TILE_B, F) tile streaming over the batch.
    # w_ref: (F, O_pad) VMEM-resident (same block every grid step).
    # b_ref: (1, O_pad) VMEM-resident.
    # o_ref: (TILE_B, O_pad) lane-dense output tile.
    x = x_ref[...].astype(w_ref.dtype)            # in-register cast (no-op for f32)
    acc = jnp.dot(x, w_ref[...], preferred_element_type=jnp.float32)
    o_ref[...] = (acc + b_ref[...]).astype(o_ref.dtype)


def prepare_classifier_params(weight, bias, *, o_pad_multiple=128,
                              compute_dtype=jnp.float32):
    """One-time parameter prep (outside the per-call hot path).

    weight: (O, F) PyTorch Linear layout; bias: (O,).
    Returns (w_fo_padded (F, O_pad), bias_padded (1, O_pad), O).
    Padded columns are zero so garbage lanes never leak.
    Use compute_dtype=jnp.bfloat16 on v5e/v6e for bf16 MXU passes
    (accumulation stays f32 inside the kernel).
    """
    O, F = weight.shape
    O_pad = _round_up(O, o_pad_multiple)
    w_fo = jnp.transpose(weight).astype(compute_dtype)           # (F, O)
    w_fo = jnp.pad(w_fo, ((0, 0), (0, O_pad - O)))               # (F, O_pad)
    b2d = jnp.pad(bias.astype(jnp.float32), (0, O_pad - O)).reshape(1, O_pad)
    return w_fo, b2d, O


def _choose_tile_b(B: int) -> int:
    """Batch-tile size: big enough to amortize per-step overhead, but keep
    >= 2 grid steps when possible so v7x's two TensorCores both get work."""
    if B <= 8:
        return _round_up(max(B, 1), 8)
    # Split the batch in (at least) two, cap at 1024 rows, sublane-align.
    return max(8, min(1024, _round_up(pl.cdiv(B, 2), 8)))


@jax.jit
def classifier_forward(x, w_fo_padded, bias_padded):
    """Hot path. x: (B, F); w_fo_padded: (F, O_pad); bias_padded: (1, O_pad).

    Returns the lane-dense padded logits (B, O_pad); padded columns are zero.
    Downstream consumers (softmax / loss) should ignore or mask the padded
    lanes instead of forcing a 256->250 slice (an extra HBM pass).
    """
    B, F = x.shape
    O_pad = w_fo_padded.shape[1]

    TILE_B = _choose_tile_b(B)
    grid = (pl.cdiv(B, TILE_B),)   # ragged last block is masked by Pallas

    bytes_accessed = (
        B * F * x.dtype.itemsize                      # x read
        + F * O_pad * w_fo_padded.dtype.itemsize      # resident weight
        + O_pad * 4                                   # bias
        + B * O_pad * 4                               # output write
    )

    return pl.pallas_call(
        linear_kernel,
        out_shape=jax.ShapeDtypeStruct((B, O_pad), jnp.float32),
        grid_spec=pl.GridSpec(
            grid=grid,
            in_specs=[
                # x tile marches over the batch.
                pl.BlockSpec((TILE_B, F), lambda i: (i, 0)),
                # Weight + bias: same block every step -> stay VMEM-resident.
                pl.BlockSpec((F, O_pad), lambda i: (0, 0)),
                pl.BlockSpec((1, O_pad), lambda i: (0, 0)),
            ],
            out_specs=pl.BlockSpec((TILE_B, O_pad), lambda i: (i, 0)),
        ),
        compiler_params=pltpu.CompilerParams(
            # Independent batch tiles: shard across both TCs on v7x.
            dimension_semantics=("parallel",),
        ),
        cost_estimate=pl.CostEstimate(
            flops=2 * B * F * O_pad,
            transcendentals=0,
            bytes_accessed=bytes_accessed,
        ),
    )(x, w_fo_padded, bias_padded)


def classifier_forward_sliced(x, w_fo_padded, bias_padded, n_output):
    """Convenience wrapper matching the exact PyTorch forward signature:
    returns (B, n_output). Prefer `classifier_forward` in hot loops."""
    return classifier_forward(x, w_fo_padded, bias_padded)[:, :n_output]


if __name__ == "__main__":
    # Module defaults: n_feature=512, n_output=250 (n_hidden unused in forward).
    F, O = 512, 250

    key = jax.random.PRNGKey(0)
    kx, kw, kb, kx2 = jax.random.split(key, 4)

    # Deterministic "Kaiming-uniform-ish" init, PyTorch weight layout (O, F).
    bound = 1.0 / jnp.sqrt(F)
    weight = jax.random.uniform(kw, (O, F), minval=-bound, maxval=bound,
                                dtype=jnp.float32)
    bias = jax.random.uniform(kb, (O,), minval=-bound, maxval=bound,
                              dtype=jnp.float32)

    # One-time prep: transpose + pad O to 256, outside the per-call hot path.
    w_fo, b2d, n_out = prepare_classifier_params(weight, bias)

    # --- Small batch (matches the tiny-head use case) -----------------------
    B = 8
    x = jax.random.normal(kx, (B, F), dtype=jnp.float32)
    out_pad = jax.block_until_ready(classifier_forward(x, w_fo, b2d))
    ref = x @ weight.T + bias
    assert out_pad.shape == (B, 256)
    out = out_pad[:, :n_out]
    assert out.shape == (B, O)
    assert jnp.allclose(out, ref, atol=1e-4, rtol=1e-4)
    # Padded lanes must be exactly the (zero) padded bias -> zero here.
    assert jnp.all(out_pad[:, n_out:] == 0.0)

    # --- Non-multiple batch (exercises ragged-last-block masking) -----------
    B2 = 300
    x2 = jax.random.normal(kx2, (B2, F), dtype=jnp.float32)
    out2 = classifier_forward_sliced(x2, w_fo, b2d, n_out)
    out2 = jax.block_until_ready(out2)
    ref2 = x2 @ weight.T + bias
    assert out2.shape == (B2, O)
    assert jnp.allclose(out2, ref2, atol=1e-4, rtol=1e-4)

    print("KERNEL_OK")
</pallas_src>

<mosaic_0001>
module attributes {stable_mosaic.version = 11 : i64} {
  func.func @linear_kernel(%arg0: i32, %arg1: memref<8x512xf32, #tpu.memory_space<vmem>>, %arg2: memref<512x256xf32, #tpu.memory_space<vmem>>, %arg3: memref<1x256xf32, #tpu.memory_space<vmem>>, %arg4: memref<8x256xf32, #tpu.memory_space<vmem>>) attributes {dimension_semantics = [#tpu.dimension_semantics<parallel>], iteration_bounds = array<i64: 1>, scalar_prefetch = 0 : i64, scratch_operands = 0 : i64, tpu.core_type = #tpu.core_type<tc>, window_params = [{transform_indices = @transform_0, window_bounds = array<i64: 8, 512>}, {pipeline_mode = #tpu.pipeline_mode<synchronous>, transform_indices = @transform_1, window_bounds = array<i64: 512, 256>}, {pipeline_mode = #tpu.pipeline_mode<synchronous>, transform_indices = @transform_2, window_bounds = array<i64: 1, 256>}, {transform_indices = @transform_3, window_bounds = array<i64: 8, 256>}]} {
    %c0 = arith.constant 0 : index
    %c0_0 = arith.constant 0 : index
    %0 = vector.load %arg1[%c0, %c0_0] : memref<8x512xf32, #tpu.memory_space<vmem>>, vector<8x512xf32>
    %c0_1 = arith.constant 0 : index
    %c0_2 = arith.constant 0 : index
    %1 = vector.load %arg2[%c0_1, %c0_2] : memref<512x256xf32, #tpu.memory_space<vmem>>, vector<512x256xf32>
    %cst = arith.constant dense<0.000000e+00> : vector<8x256xf32>
    %2 = tpu.matmul %0, %1, %cst {dimension_numbers = #tpu.dot_dimension_numbers<[1], [0], [0], [1], [0, 0, 1, 1], [], []>} : vector<8x512xf32>, vector<512x256xf32>, vector<8x256xf32> -> vector<8x256xf32>
    %c0_3 = arith.constant 0 : index
    %c0_4 = arith.constant 0 : index
    %3 = vector.load %arg3[%c0_3, %c0_4] : memref<1x256xf32, #tpu.memory_space<vmem>>, vector<1x256xf32>
    %4 = vector.broadcast %3 : vector<1x256xf32> to vector<8x256xf32>
    %5 = arith.addf %2, %4 : vector<8x256xf32>
    %c0_5 = arith.constant 0 : index
    %c0_6 = arith.constant 0 : index
    %6 = vector.load %arg4[%c0_5, %c0_6] : memref<8x256xf32, #tpu.memory_space<vmem>>, vector<8x256xf32>
    tpu.vector_store %arg4[%c0_5, %c0_6], %5 {strides = array<i32>} : memref<8x256xf32, #tpu.memory_space<vmem>>, vector<8x256xf32>,
    return
  }
  func.func @transform_0(%arg0: i32) -> (i32, i32) {
    %c0_i32 = arith.constant 0 : i32
    %c0_i32_0 = arith.constant 0 : i32
    return %arg0, %c0_i32 : i32, i32
  }
  func.func @transform_1(%arg0: i32) -> (i32, i32) {
    %c0_i32 = arith.constant 0 : i32
    %c0_i32_0 = arith.constant 0 : i32
    %c0_i32_1 = arith.constant 0 : i32
    return %c0_i32, %c0_i32_0 : i32, i32
  }
  func.func @transform_2(%arg0: i32) -> (i32, i32) {
    %c0_i32 = arith.constant 0 : i32
    %c0_i32_0 = arith.constant 0 : i32
    %c0_i32_1 = arith.constant 0 : i32
    return %c0_i32, %c0_i32_0 : i32, i32
  }
  func.func @transform_3(%arg0: i32) -> (i32, i32) {
    %c0_i32 = arith.constant 0 : i32
    %c0_i32_0 = arith.constant 0 : i32
    return %arg0, %c0_i32 : i32, i32
  }
}

</mosaic_0001>

<bundles_post_ra>
// kernel: classifier_forward.1
= control target key start
LH: loop header
LB: loop body
LE: loop exit
PB: predicated region body
PF: predicated region fallthrough
CT: control target
= control target key end

     0   :  { %8 = vsyncpa [#allocation3], 0  ;;  %s522_s0 = inlined_call_operand.hbm [shape: f32[8,512], index: 0, kind: input, shape index: {}]   ;;  %s523_s1 = inlined_call_operand.hbm [shape: f32[512,256], index: 1, kind: input, shape index: {}]   ;;  %s524_s2 = inlined_call_operand.hbm [shape: f32[1,256], index: 2, kind: input, shape index: {}]   ;;  %s525_s3 = inlined_call_operand.hbm [shape: f32[8,256], index: 3, kind: output, shape index: {}]  }
   0x1   :  { %9 = vsyncpa [#allocation6], 0  ;;  %s26_s14 = sshll.u32 %s523_s1, 4  ;;  %s27_s14 = int_to_ptr.hbm [resolvable:$true] %s26_s14 }
   0x2   :  { %10 = vsyncpa [#allocation4], 0  ;;  %s484_s15 = smov [#allocation5]   ;;  %s16_s19 = sshll.u32 %s522_s0, 4  ;;  %s17_s19 = int_to_ptr.hbm [resolvable:$true] %s16_s19 }
   0x3   :  { %s28_s16 = sshll.u32 %s484_s15, 4  ;;  %s485_s20 = smov 256   ;;  %s29_s16 = int_to_ptr.vmem [resolvable:$true] %s28_s16 }
   0x4   :  { %s486_s21 = smov 16   ;;  %s487_s22 = smov [#allocation2]  }
   0x5   :  { %34 = dma.hbm_to_vmem [thread:$0]  %s27_s14, 16384, %s29_s16, [#allocation6], %s485_s20, %s485_s20, %s486_s21  }
   0x6   :  { %s18_s23 = sshll.u32 %s487_s22, 4  ;;  %s40_s26 = sshll.u32 %s524_s2, 4  ;;  %s19_s23 = int_to_ptr.vmem [resolvable:$true] %s18_s23  ;;  %s41_s26 = int_to_ptr.hbm [resolvable:$true] %s40_s26 }
   0x7   :  { %21 = dma.hbm_to_vmem [thread:$0]  %s17_s19, 512, %s19_s23, [#allocation3]  }
   0x8   :  { %s488_s1 = smov [#allocation7]  }
   0x9   :  { %s42_s27 = sshll.u32 %s488_s1, 4  ;;  %s43_s27 = int_to_ptr.vmem [resolvable:$true] %s42_s27 }
   0xa   :  { %45 = dma.hbm_to_vmem [thread:$0]  %s41_s26, 32, %s43_s27, [#allocation6]  }
   0xb   :  { %478 = dma.done.wait [#allocation3], 512  }
   0xc   :  { %479 = vsyncadd [#allocation3], 4294966784 }
   0xd   :  { %480 = dma.done.wait [#allocation6], 16416  }
   0xe   :  { %481 = vsyncadd [#allocation6], 4294950880  ;;  %v156_v0 = vld [vmem:[#allocation5 + $0x2f0] sm:$0xff]  ;;  %v154_v2 = vld [vmem:[#allocation5 + $0x2e0] sm:$0xff]  ;;  %s489_s0 = smov [#allocation8]   ;;  %s365_s30 = sshll.u32 %s525_s3, 4  ;;  %s366_s30 = int_to_ptr.hbm [resolvable:$true] %s365_s30 }
   0xf   :  { %v92_v1 = vld [vmem:[#allocation5 + $0xf0] sm:$0xff]  ;;  %236 = vmatpush.msra.mxu2 %v156_v0  ;;  %v90_v4 = vld [vmem:[#allocation5 + $0xe0] sm:$0xff]  ;;  %v157_v62 = vld [vmem:[#allocation5 + $0x2f8] sm:$0xff]  ;;  %s363_s2 = sshll.u32 %s489_s0, 4  ;;  %s364_s2 = int_to_ptr.vmem [resolvable:$true] %s363_s2 }
  0x10   :  { %196 = vmatpush.msra.mxu0 %v92_v1  ;;  %v188_v3 = vld [vmem:[#allocation5 + $0x3f0] sm:$0xff]  ;;  %v186_v7 = vld [vmem:[#allocation5 + $0x3e0] sm:$0xff]  ;;  %v93_v0 = vld [vmem:[#allocation5 + $0xf8] sm:$0xff] }
  0x11   :  { %v124_v5 = vld [vmem:[#allocation5 + $0x1f0] sm:$0xff]  ;;  %256 = vmatpush.msra.mxu3 %v188_v3  ;;  %237 = vmatpush.msra.mxu2 %v154_v2  ;;  %v122_v9 = vld [vmem:[#allocation5 + $0x1e0] sm:$0xff]  ;;  %v189_v1 = vld [vmem:[#allocation5 + $0x3f8] sm:$0xff] }
  0x12   :  { %216 = vmatpush.msra.mxu1 %v124_v5  ;;  %v152_v6 = vld [vmem:[#allocation5 + $0x2d0] sm:$0xff]  ;;  %197 = vmatpush.msra.mxu0 %v90_v4  ;;  %v150_v11 = vld [vmem:[#allocation5 + $0x2c0] sm:$0xff]  ;;  %v155_v2 = vld [vmem:[#allocation5 + $0x2e8] sm:$0xff] }
  0x13   :  { %v88_v8 = vld [vmem:[#allocation5 + $0xd0] sm:$0xff]  ;;  %257 = vmatpush.msra.mxu3 %v186_v7  ;;  %v86_v12 = vld [vmem:[#allocation5 + $0xc0] sm:$0xff]  ;;  %238 = vmatpush.msra.mxu2 %v152_v6  ;;  %v91_v4 = vld [vmem:[#allocation5 + $0xe8] sm:$0xff] }
  0x14   :  { %v184_v10 = vld [vmem:[#allocation5 + $0x3d0] sm:$0xff]  ;;  %217 = vmatpush.msra.mxu1 %v122_v9  ;;  %198 = vmatpush.msra.mxu0 %v88_v8  ;;  %v182_v14 = vld [vmem:[#allocation5 + $0x3c0] sm:$0xff]  ;;  %v125_v5 = vld [vmem:[#allocation5 + $0x1f8] sm:$0xff] }
  0x15   :  { %v120_v13 = vld [vmem:[#allocation5 + $0x1d0] sm:$0xff]  ;;  %v118_v15 = vld [vmem:[#allocation5 + $0x1c0] sm:$0xff]  ;;  %258 = vmatpush.msra.mxu3 %v184_v10  ;;  %239 = vmatpush.msra.mxu2 %v150_v11  ;;  %v153_v6 = vld [vmem:[#allocation5 + $0x2d8] sm:$0xff] }
  0x16   :  { %218 = vmatpush.msra.mxu1 %v120_v13  ;;  %v148_v16 = vld [vmem:[#allocation5 + $0x2b0] sm:$0xff]  ;;  %199 = vmatpush.msra.mxu0 %v86_v12  ;;  %v146_v20 = vld [vmem:[#allocation5 + $0x2a0] sm:$0xff]  ;;  %v187_v7 = vld [vmem:[#allocation5 + $0x3e8] sm:$0xff] }
  0x17   :  { %v84_v17 = vld [vmem:[#allocation5 + $0xb0] sm:$0xff]  ;;  %259 = vmatpush.msra.mxu3 %v182_v14  ;;  %v82_v21 = vld [vmem:[#allocation5 + $0xa0] sm:$0xff]  ;;  %240 = vmatpush.msra.mxu2 %v148_v16  ;;  %v89_v8 = vld [vmem:[#allocation5 + $0xd8] sm:$0xff] }
  0x18   :  { %v180_v18 = vld [vmem:[#allocation5 + $0x3b0] sm:$0xff]  ;;  %219 = vmatpush.msra.mxu1 %v118_v15  ;;  %200 = vmatpush.msra.mxu0 %v84_v17  ;;  %v178_v22 = vld [vmem:[#allocation5 + $0x3a0] sm:$0xff]  ;;  %v123_v9 = vld [vmem:[#allocation5 + $0x1e8] sm:$0xff] }
  0x19   :  { %v116_v19 = vld [vmem:[#allocation5 + $0x1b0] sm:$0xff]  ;;  %v114_v23 = vld [vmem:[#allocation5 + $0x1a0] sm:$0xff]  ;;  %260 = vmatpush.msra.mxu3 %v180_v18  ;;  %241 = vmatpush.msra.mxu2 %v146_v20  ;;  %v151_v10 = vld [vmem:[#allocation5 + $0x2c8] sm:$0xff] }
  0x1a   :  { %220 = vmatpush.msra.mxu1 %v116_v19  ;;  %v144_v24 = vld [vmem:[#allocation5 + $0x290] sm:$0xff]  ;;  %201 = vmatpush.msra.mxu0 %v82_v21  ;;  %v142_v28 = vld [vmem:[#allocation5 + $0x280] sm:$0xff]  ;;  %v185_v11 = vld [vmem:[#allocation5 + $0x3d8] sm:$0xff] }
  0x1b   :  { %v80_v25 = vld [vmem:[#allocation5 + $0x90] sm:$0xff]  ;;  %261 = vmatpush.msra.mxu3 %v178_v22  ;;  %v78_v29 = vld [vmem:[#allocation5 + $0x80] sm:$0xff]  ;;  %242 = vmatpush.msra.mxu2 %v144_v24  ;;  %v87_v12 = vld [vmem:[#allocation5 + $0xc8] sm:$0xff] }
  0x1c   :  { %v176_v26 = vld [vmem:[#allocation5 + $0x390] sm:$0xff]  ;;  %221 = vmatpush.msra.mxu1 %v114_v23  ;;  %202 = vmatpush.msra.mxu0 %v80_v25  ;;  %v174_v30 = vld [vmem:[#allocation5 + $0x380] sm:$0xff]  ;;  %v121_v13 = vld [vmem:[#allocation5 + $0x1d8] sm:$0xff] }
  0x1d   :  { %v112_v27 = vld [vmem:[#allocation5 + $0x190] sm:$0xff]  ;;  %v110_v31 = vld [vmem:[#allocation5 + $0x180] sm:$0xff]  ;;  %262 = vmatpush.msra.mxu3 %v176_v26  ;;  %243 = vmatpush.msra.mxu2 %v142_v28  ;;  %v149_v14 = vld [vmem:[#allocation5 + $0x2b8] sm:$0xff] }
  0x1e   :  { %222 = vmatpush.msra.mxu1 %v112_v27  ;;  %v140_v32 = vld [vmem:[#allocation5 + $0x270] sm:$0xff]  ;;  %203 = vmatpush.msra.mxu0 %v78_v29  ;;  %v138_v36 = vld [vmem:[#allocation5 + $0x260] sm:$0xff]  ;;  %v183_v15 = vld [vmem:[#allocation5 + $0x3c8] sm:$0xff] }
  0x1f   :  { %v76_v33 = vld [vmem:[#allocation5 + $0x70] sm:$0xff]  ;;  %263 = vmatpush.msra.mxu3 %v174_v30  ;;  %v74_v37 = vld [vmem:[#allocation5 + $0x60] sm:$0xff]  ;;  %244 = vmatpush.msra.mxu2 %v140_v32  ;;  %v85_v16 = vld [vmem:[#allocation5 + $0xb8] sm:$0xff] }
  0x20   :  { %v172_v34 = vld [vmem:[#allocation5 + $0x370] sm:$0xff]  ;;  %223 = vmatpush.msra.mxu1 %v110_v31  ;;  %204 = vmatpush.msra.mxu0 %v76_v33  ;;  %v170_v38 = vld [vmem:[#allocation5 + $0x360] sm:$0xff]  ;;  %v119_v17 = vld [vmem:[#allocation5 + $0x1c8] sm:$0xff] }
  0x21   :  { %v108_v35 = vld [vmem:[#allocation5 + $0x170] sm:$0xff]  ;;  %v106_v39 = vld [vmem:[#allocation5 + $0x160] sm:$0xff]  ;;  %264 = vmatpush.msra.mxu3 %v172_v34  ;;  %245 = vmatpush.msra.mxu2 %v138_v36  ;;  %v147_v18 = vld [vmem:[#allocation5 + $0x2a8] sm:$0xff] }
  0x22   :  { %224 = vmatpush.msra.mxu1 %v108_v35  ;;  %v136_v40 = vld [vmem:[#allocation5 + $0x250] sm:$0xff]  ;;  %205 = vmatpush.msra.mxu0 %v74_v37  ;;  %v134_v44 = vld [vmem:[#allocation5 + $0x240] sm:$0xff]  ;;  %v181_v19 = vld [vmem:[#allocation5 + $0x3b8] sm:$0xff] }
  0x23   :  { %v72_v41 = vld [vmem:[#allocation5 + $0x50] sm:$0xff]  ;;  %265 = vmatpush.msra.mxu3 %v170_v38  ;;  %v70_v45 = vld [vmem:[#allocation5 + $0x40] sm:$0xff]  ;;  %246 = vmatpush.msra.mxu2 %v136_v40  ;;  %v83_v20 = vld [vmem:[#allocation5 + $0xa8] sm:$0xff] }
  0x24   :  { %v168_v42 = vld [vmem:[#allocation5 + $0x350] sm:$0xff]  ;;  %225 = vmatpush.msra.mxu1 %v106_v39  ;;  %206 = vmatpush.msra.mxu0 %v72_v41  ;;  %v166_v46 = vld [vmem:[#allocation5 + $0x340] sm:$0xff]  ;;  %v117_v21 = vld [vmem:[#allocation5 + $0x1b8] sm:$0xff] }
  0x25   :  { %v104_v43 = vld [vmem:[#allocation5 + $0x150] sm:$0xff]  ;;  %v102_v47 = vld [vmem:[#allocation5 + $0x140] sm:$0xff]  ;;  %266 = vmatpush.msra.mxu3 %v168_v42  ;;  %247 = vmatpush.msra.mxu2 %v134_v44  ;;  %v145_v22 = vld [vmem:[#allocation5 + $0x298] sm:$0xff] }
  0x26   :  { %226 = vmatpush.msra.mxu1 %v104_v43  ;;  %v132_v48 = vld [vmem:[#allocation5 + $0x230] sm:$0xff]  ;;  %207 = vmatpush.msra.mxu0 %v70_v45  ;;  %v130_v52 = vld [vmem:[#allocation5 + $0x220] sm:$0xff]  ;;  %v179_v23 = vld [vmem:[#allocation5 + $0x3a8] sm:$0xff] }
  0x27   :  { %v68_v49 = vld [vmem:[#allocation5 + $0x30] sm:$0xff]  ;;  %267 = vmatpush.msra.mxu3 %v166_v46  ;;  %v66_v53 = vld [vmem:[#allocation5 + $0x20] sm:$0xff]  ;;  %248 = vmatpush.msra.mxu2 %v132_v48  ;;  %v81_v24 = vld [vmem:[#allocation5 + $0x98] sm:$0xff] }
  0x28   :  { %v164_v50 = vld [vmem:[#allocation5 + $0x330] sm:$0xff]  ;;  %227 = vmatpush.msra.mxu1 %v102_v47  ;;  %208 = vmatpush.msra.mxu0 %v68_v49  ;;  %v162_v54 = vld [vmem:[#allocation5 + $0x320] sm:$0xff]  ;;  %v115_v25 = vld [vmem:[#allocation5 + $0x1a8] sm:$0xff] }
  0x29   :  { %v100_v51 = vld [vmem:[#allocation5 + $0x130] sm:$0xff]  ;;  %v98_v55 = vld [vmem:[#allocation5 + $0x120] sm:$0xff]  ;;  %268 = vmatpush.msra.mxu3 %v164_v50  ;;  %249 = vmatpush.msra.mxu2 %v130_v52  ;;  %v143_v26 = vld [vmem:[#allocation5 + $0x288] sm:$0xff] }
  0x2a   :  { %228 = vmatpush.msra.mxu1 %v100_v51  ;;  %v128_v56 = vld [vmem:[#allocation5 + $0x210] sm:$0xff]  ;;  %209 = vmatpush.msra.mxu0 %v66_v53  ;;  %v126_v60 = vld [vmem:[#allocation5 + $0x200] sm:$0xff]  ;;  %v177_v27 = vld [vmem:[#allocation5 + $0x398] sm:$0xff] }
  0x2b   :  { %v64_v57 = vld [vmem:[#allocation5 + $0x10] sm:$0xff]  ;;  %269 = vmatpush.msra.mxu3 %v162_v54  ;;  %v62_v61 = vld [vmem:[#allocation5] sm:$0xff]  ;;  %250 = vmatpush.msra.mxu2 %v128_v56  ;;  %v79_v28 = vld [vmem:[#allocation5 + $0x88] sm:$0xff] }
  0x2c   :  { %v160_v58 = vld [vmem:[#allocation5 + $0x310] sm:$0xff]  ;;  %229 = vmatpush.msra.mxu1 %v98_v55  ;;  %210 = vmatpush.msra.mxu0 %v64_v57  ;;  %v158_v63 = vld [vmem:[#allocation5 + $0x300] sm:$0xff]  ;;  %v113_v29 = vld [vmem:[#allocation5 + $0x198] sm:$0xff] }
  0x2d   :  { %v96_v59 = vld [vmem:[#allocation5 + $0x110] sm:$0xff]  ;;  %270 = vmatpush.msra.mxu3 %v160_v58  ;;  %251 = vmatpush.msra.mxu2 %v126_v60  ;;  %v94_v3 = vld [vmem:[#allocation5 + $0x100] sm:$0xff]  ;;  %v141_v30 = vld [vmem:[#allocation5 + $0x278] sm:$0xff] }
  0x2e   :  { %230 = vmatpush.msra.mxu1 %v96_v59  ;;  %211 = vmatpush.msra.mxu0 %v62_v61  ;;  %v175_v31 = vld [vmem:[#allocation5 + $0x388] sm:$0xff]  ;;  %v77_v32 = vld [vmem:[#allocation5 + $0x78] sm:$0xff]  ;;  %v60_v44 = vld [vmem:[#allocation2 + $0x10] sm:$0xff] }
  0x2f   :  { %316 = vmatpush.msrb.mxu2 %v157_v62  ;;  %271 = vmatpush.msra.mxu3 %v158_v63  ;;  %v111_v33 = vld [vmem:[#allocation5 + $0x188] sm:$0xff]  ;;  %v173_v35 = vld [vmem:[#allocation5 + $0x378] sm:$0xff]  ;;  %v58_v49 = vld [vmem:[#allocation2] sm:$0xff] }
  0x30   :  { %276 = vmatpush.msrb.mxu0 %v93_v0  ;;  %231 = vmatpush.msra.mxu1 %v94_v3  ;;  %v139_v34 = vld [vmem:[#allocation5 + $0x268] sm:$0xff]  ;;  %v109_v37 = vld [vmem:[#allocation5 + $0x178] sm:$0xff] }
  0x31   :  { %336 = vmatpush.msrb.mxu3 %v189_v1  ;;  %317 = vmatpush.msrb.mxu2 %v155_v2  ;;  %v75_v36 = vld [vmem:[#allocation5 + $0x68] sm:$0xff]  ;;  %v137_v38 = vld [vmem:[#allocation5 + $0x258] sm:$0xff] }
  0x32   :  { %277 = vmatpush.msrb.mxu0 %v91_v4  ;;  %296 = vmatpush.msrb.mxu1 %v125_v5  ;;  %v171_v39 = vld [vmem:[#allocation5 + $0x368] sm:$0xff]  ;;  %v73_v40 = vld [vmem:[#allocation5 + $0x58] sm:$0xff]  ;;  %v190_v4 = vld [vmem:[#allocation7] sm:$0x3] }
  0x33   :  { %318 = vmatpush.msrb.mxu2 %v153_v6  ;;  %337 = vmatpush.msrb.mxu3 %v187_v7  ;;  %v107_v41 = vld [vmem:[#allocation5 + $0x168] sm:$0xff]  ;;  %v169_v43 = vld [vmem:[#allocation5 + $0x358] sm:$0xff]  ;;  %v192_v5 = vperm.slane %v190_v4, 0 }
  0x34   :  { %278 = vmatpush.msrb.mxu0 %v89_v8  ;;  %297 = vmatpush.msrb.mxu1 %v123_v9  ;;  %v135_v42 = vld [vmem:[#allocation5 + $0x248] sm:$0xff]  ;;  %v105_v46 = vld [vmem:[#allocation5 + $0x158] sm:$0xff] }
  0x35   :  { %319 = vmatpush.msrb.mxu2 %v151_v10  ;;  %338 = vmatpush.msrb.mxu3 %v185_v11  ;;  %v71_v45 = vld [vmem:[#allocation5 + $0x48] sm:$0xff]  ;;  %v133_v47 = vld [vmem:[#allocation5 + $0x238] sm:$0xff] }
  0x36   :  { %279 = vmatpush.msrb.mxu0 %v87_v12  ;;  %298 = vmatpush.msrb.mxu1 %v121_v13  ;;  %v167_v48 = vld [vmem:[#allocation5 + $0x348] sm:$0xff]  ;;  %v61_v50 = vld [vmem:[#allocation2 + $0x18] sm:$0xff]  ;;  %v193_v13 = vperm.slane %v190_v4, 1 }
  0x37   :  { %320 = vmatpush.msrb.mxu2 %v149_v14  ;;  %339 = vmatpush.msrb.mxu3 %v183_v15  ;;  %v69_v51 = vld [vmem:[#allocation5 + $0x38] sm:$0xff]  ;;  %v103_v52 = vld [vmem:[#allocation5 + $0x148] sm:$0xff] }
  0x38   :  { %280 = vmatpush.msrb.mxu0 %v85_v16  ;;  %299 = vmatpush.msrb.mxu1 %v119_v17  ;;  %v131_v53 = vld [vmem:[#allocation5 + $0x228] sm:$0xff]  ;;  %v165_v54 = vld [vmem:[#allocation5 + $0x338] sm:$0xff] }
  0x39   :  { %321 = vmatpush.msrb.mxu2 %v147_v18  ;;  %340 = vmatpush.msrb.mxu3 %v181_v19  ;;  %v59_v55 = vld [vmem:[#allocation2 + $0x8] sm:$0xff]  ;;  %v101_v57 = vld [vmem:[#allocation5 + $0x138] sm:$0xff] }
  0x3a   :  { %281 = vmatpush.msrb.mxu0 %v83_v20  ;;  %300 = vmatpush.msrb.mxu1 %v117_v21  ;;  %v67_v56 = vld [vmem:[#allocation5 + $0x28] sm:$0xff]  ;;  %v129_v58 = vld [vmem:[#allocation5 + $0x218] sm:$0xff] }
  0x3b   :  { %322 = vmatpush.msrb.mxu2 %v145_v22  ;;  %341 = vmatpush.msrb.mxu3 %v179_v23  ;;  %v163_v59 = vld [vmem:[#allocation5 + $0x328] sm:$0xff]  ;;  %v65_v60 = vld [vmem:[#allocation5 + $0x18] sm:$0xff] }
  0x3c   :  { %282 = vmatpush.msrb.mxu0 %v81_v24  ;;  %301 = vmatpush.msrb.mxu1 %v115_v25  ;;  %v99_v61 = vld [vmem:[#allocation5 + $0x128] sm:$0xff]  ;;  %v161_v63 = vld [vmem:[#allocation5 + $0x318] sm:$0xff] }
  0x3d   :  { %323 = vmatpush.msrb.mxu2 %v143_v26  ;;  %342 = vmatpush.msrb.mxu3 %v177_v27  ;;  %v127_v62 = vld [vmem:[#allocation5 + $0x208] sm:$0xff]  ;;  %v97_v1 = vld [vmem:[#allocation5 + $0x118] sm:$0xff] }
  0x3e   :  { %283 = vmatpush.msrb.mxu0 %v79_v28  ;;  %302 = vmatpush.msrb.mxu1 %v113_v29  ;;  %v63_v0 = vld [vmem:[#allocation5 + $0x8] sm:$0xff] }
  0x3f   :  { %324 = vmatpush.msrb.mxu2 %v141_v30  ;;  %343 = vmatpush.msrb.mxu3 %v175_v31  ;;  %v159_v2 = vld [vmem:[#allocation5 + $0x308] sm:$0xff] }
  0x40   :  { %284 = vmatpush.msrb.mxu0 %v77_v32  ;;  %303 = vmatpush.msrb.mxu1 %v111_v33  ;;  %v95_v3 = vld [vmem:[#allocation5 + $0x108] sm:$0xff] }
  0x41   :  { %325 = vmatpush.msrb.mxu2 %v139_v34  ;;  %344 = vmatpush.msrb.mxu3 %v173_v35 }
  0x42   :  { %285 = vmatpush.msrb.mxu0 %v75_v36  ;;  %304 = vmatpush.msrb.mxu1 %v109_v37 }
  0x43   :  { %326 = vmatpush.msrb.mxu2 %v137_v38  ;;  %345 = vmatpush.msrb.mxu3 %v171_v39 }
  0x44   :  { %286 = vmatpush.msrb.mxu0 %v73_v40  ;;  %305 = vmatpush.msrb.mxu1 %v107_v41 }
  0x45   :  { %327 = vmatpush.msrb.mxu2 %v135_v42  ;;  %346 = vmatpush.msrb.mxu3 %v169_v43 }
  0x46   :  { %252 = vmatmul.f32.vlgmr.msra.gmra.mxu2 %v60_v44  ;;  %287 = vmatpush.msrb.mxu0 %v71_v45 }
  0x47   :  { %306 = vmatpush.msrb.mxu1 %v105_v46  ;;  %328 = vmatpush.msrb.mxu2 %v133_v47 }
  0x48   :  { %347 = vmatpush.msrb.mxu3 %v167_v48  ;;  %212 = vmatmul.f32.vlgmr.msra.gmra.mxu0 %v58_v49 }
  0x49   :  { %272 = vmatmul.f32.vlgmr.msra.gmra.mxu3 %v61_v50  ;;  %288 = vmatpush.msrb.mxu0 %v69_v51 }
  0x4a   :  { %307 = vmatpush.msrb.mxu1 %v103_v52  ;;  %329 = vmatpush.msrb.mxu2 %v131_v53 }
  0x4b   :  { %348 = vmatpush.msrb.mxu3 %v165_v54  ;;  %232 = vmatmul.f32.vlgmr.msra.gmra.mxu1 %v59_v55 }
  0x4c   :  { %289 = vmatpush.msrb.mxu0 %v67_v56  ;;  %308 = vmatpush.msrb.mxu1 %v101_v57 }
  0x4d   :  { %330 = vmatpush.msrb.mxu2 %v129_v58  ;;  %349 = vmatpush.msrb.mxu3 %v163_v59 }
  0x4e   :  { %290 = vmatpush.msrb.mxu0 %v65_v60  ;;  %309 = vmatpush.msrb.mxu1 %v99_v61 }
  0x4f   :  { %331 = vmatpush.msrb.mxu2 %v127_v62  ;;  %350 = vmatpush.msrb.mxu3 %v161_v63 }
  0x50   :  { %332 = vmatmul.f32.vlgmr.msrb.gmra.mxu2 %v60_v44  ;;  %291 = vmatpush.msrb.mxu0 %v63_v0 }
  0x51   :  { %310 = vmatpush.msrb.mxu1 %v97_v1  ;;  %351 = vmatpush.msrb.mxu3 %v159_v2 }
  0x52   :  { %292 = vmatmul.f32.vlgmr.msrb.gmra.mxu0 %v58_v49  ;;  %352 = vmatmul.f32.vlgmr.msrb.gmra.mxu3 %v61_v50 }
  0x53   :  { %311 = vmatpush.msrb.mxu1 %v95_v3 }
  0x54   :  { %312 = vmatmul.f32.vlgmr.msrb.gmra.mxu1 %v59_v55 }
  0xc5   :  { %v213_v6 = vpop.f32.mrf.mxu0 }
  0xc6   :  { %v214_v7 = vadd.f32 %v213_v6, %v192_v5 }
  0xc8   :  { %v233_v8 = vpop.f32.mrf.mxu1 }
  0xc9   :  { %v234_v9 = vadd.f32 %v233_v8, %v214_v7  ;;  %v253_v10 = vpop.f32.mrf.mxu2 }
  0xcb   :  { %v254_v11 = vadd.f32 %v253_v10, %v234_v9 }
  0xcc   :  { %v273_v12 = vpop.f32.mrf.mxu3 }
  0xcd   :  { %v274_v14 = vadd.f32 %v273_v12, %v254_v11 }
  0xcf   :  { %356 = vst [vmem:[#allocation8] sm:$0xff] %v274_v14  ;;  %v293_v15 = vpop.f32.mrf.mxu0 }
  0xd0   :  { %v294_v16 = vadd.f32 %v293_v15, %v193_v13 }
  0xd1   :  { %v313_v17 = vpop.f32.mrf.mxu1 }
  0xd2   :  { %v314_v18 = vadd.f32 %v313_v17, %v294_v16 }
  0xd3   :  { %v333_v19 = vpop.f32.mrf.mxu2 }
  0xd4   :  { %v334_v20 = vadd.f32 %v333_v19, %v314_v18 }
  0xd5   :  { %v353_v21 = vpop.f32.mrf.mxu3 }
  0xd6   :  { %v354_v22 = vadd.f32 %v353_v21, %v334_v20 }
  0xd8   :  { %357 = vst [vmem:[#allocation8 + $0x8] sm:$0xff] %v354_v22 }
  0xd9   :  { %368 = dma.vmem_to_hbm [thread:$0]  %s364_s2, 256, %s366_s30, [#allocation4]  }
  0xda   :  { %482 = dma.done.wait [#allocation4], 256  }
  0xdb   :  { %483 = vsyncadd [#allocation4], 4294967040 }
  0xdc   :  { %373 = vsyncpa [#allocation3], 1 }
  0xdd   :  { %374 = vsyncpa [#allocation6], 1 }
  0xde   :  { %375 = vsyncpa [#allocation4], 1 }

</bundles_post_ra>
